<compile_context>
chip_gen: v7x
topology: tpu7x:2x2x1
jax: 0.10.0
libtpu: 0.0.40
codegen_flags: <defaults>
</compile_context>

<pallas_src>
import jax
import jax.numpy as jnp
from jax.experimental import pallas as pl
from jax.experimental.pallas import tpu as pltpu

EPS = 1e-5


def _round_up(x, m):
    return (x + m - 1) // m * m


def generator_kernel(z_ref, slab_ref, out_ref):
    B, LP = z_ref.shape          # z padded to LP lanes (multiple of 16)
    F = out_ref.shape[1]         # lane-dense feature width (multiple of 128)
    RW2 = LP                     # W2 rows start
    RW3 = LP + F                 # W3 rows start
    RV = LP + 2 * F              # packed per-feature vectors start

    # Per-feature vectors: one 16-row read, cast once to f32 (BN math in f32).
    vec = slab_ref[RV:RV + 16, :].astype(jnp.float32)
    g1, be1 = vec[0:1, :], vec[1:2, :]
    g2, be2 = vec[2:3, :], vec[3:4, :]
    b3 = vec[4:5, :]

    def bn(h, gamma, beta):
        # Training-mode BatchNorm1d, two-pass (numerically safe) variance.
        mu = jnp.mean(h, axis=0, keepdims=True)
        xc = h - mu
        var = jnp.mean(xc * xc, axis=0, keepdims=True)
        scale = gamma * jax.lax.rsqrt(var + EPS)     # (1, F) prep only
        return xc * scale + beta                     # one full-tile FMA

    # ---- Linear(latent -> 2H); bias omitted (cancels exactly in batch-stat BN)
    h = jnp.dot(z_ref[...].astype(jnp.bfloat16), slab_ref[0:RW2, :],
                preferred_element_type=jnp.float32)
    h = bn(h, g1, be1)
    h = jnp.maximum(h, 0.2 * h)                      # LeakyReLU(0.2)

    # ---- Linear(2H -> H); bias omitted (cancels exactly in batch-stat BN)
    h = jnp.dot(h.astype(jnp.bfloat16), slab_ref[RW2:RW3, :],
                preferred_element_type=jnp.float32)
    h = bn(h, g2, be2)
    h = jnp.maximum(h, 0.0)                          # ReLU

    # ---- Linear(H -> input_dim) + bias + Tanh
    h = jnp.dot(h.astype(jnp.bfloat16), slab_ref[RW3:RW3 + F, :],
                preferred_element_type=jnp.float32)
    out_ref[...] = jnp.tanh(h + b3)


def gan_generator_forward(z, params):
    """z: (B, latent_dim) float32 -> (B, input_dim) float32."""
    (w1, b1, g1, be1, w2, b2, g2, be2, w3, b3) = params
    del b1, b2   # mathematically a no-op before batch-stat BatchNorm
    B, latent = z.shape
    H2, H, D = w1.shape[1], w2.shape[1], w3.shape[1]

    F = _round_up(max(H2, H, D, 128), 128)   # lane-dense feature width
    LP = _round_up(latent, 16)               # bf16 packed-sublane alignment

    def pad2(m, rows, cols):
        return jnp.pad(m, ((0, rows - m.shape[0]), (0, cols - m.shape[1])))

    # One bf16 parameter slab -> 2 input DMAs total (z + slab).
    vec = jnp.concatenate(
        [pad2(g1, 1, F), pad2(be1, 1, F), pad2(g2, 1, F), pad2(be2, 1, F),
         pad2(b3, 1, F), jnp.zeros((11, F), jnp.float32)], axis=0)      # (16, F)
    slab = jnp.concatenate(
        [pad2(w1, LP, F), pad2(w2, F, F), pad2(w3, F, F), vec],
        axis=0).astype(jnp.bfloat16)                                     # (LP+2F+16, F)
    zp = jnp.pad(z, ((0, 0), (0, LP - latent)))

    vmem = pl.BlockSpec(memory_space=pltpu.MemorySpace.VMEM)
    out = pl.pallas_call(
        generator_kernel,
        out_shape=jax.ShapeDtypeStruct((B, F), jnp.float32),   # lane-dense output
        in_specs=[vmem, vmem],
        out_specs=vmem,
    )(zp, slab)
    return out[:, :D]


def init_params(key, input_dim, latent_dim, hidden_dim):
    """Deterministic synthetic parameters (PyTorch-like init, stored as (in,out))."""
    k = jax.random.split(key, 8)
    h2 = hidden_dim * 2

    def lin(kw, kb, fan_in, fan_out):
        bound = 1.0 / jnp.sqrt(fan_in)
        w = jax.random.uniform(kw, (fan_in, fan_out), jnp.float32, -bound, bound)
        b = jax.random.uniform(kb, (1, fan_out), jnp.float32, -bound, bound)
        return w, b

    w1, b1 = lin(k[0], k[1], latent_dim, h2)
    w2, b2 = lin(k[2], k[3], h2, hidden_dim)
    w3, b3 = lin(k[4], k[5], hidden_dim, input_dim)
    # BatchNorm affine params (PyTorch default init: weight=1, bias=0), kept (1, C)
    g1 = jnp.ones((1, h2), jnp.float32)
    be1 = jnp.zeros((1, h2), jnp.float32)
    g2 = jnp.ones((1, hidden_dim), jnp.float32)
    be2 = jnp.zeros((1, hidden_dim), jnp.float32)
    return (w1, b1, g1, be1, w2, b2, g2, be2, w3, b3)


def reference_forward(z, params):
    """Plain-JAX reference of the PyTorch generator forward.

    Uses the same bf16 parameter/operand quantization as the kernel (so the
    comparison isolates kernel logic) but keeps the full PyTorch structure:
    linear biases present, two-pass batch-stat BatchNorm, f32 elsewhere.
    """
    (w1, b1, g1, be1, w2, b2, g2, be2, w3, b3) = params
    bf = lambda a: a.astype(jnp.bfloat16)

    def bn(x, g, b):
        mu = jnp.mean(x, axis=0, keepdims=True)
        var = jnp.mean((x - mu) ** 2, axis=0, keepdims=True)
        return (x - mu) / jnp.sqrt(var + EPS) * g + b

    h = jnp.dot(bf(z), bf(w1), preferred_element_type=jnp.float32) + b1
    h = bn(h, g1, be1)
    h = jnp.where(h >= 0.0, h, 0.2 * h)
    h = jnp.dot(bf(h), bf(w2), preferred_element_type=jnp.float32) + b2
    h = bn(h, g2, be2)
    h = jnp.maximum(h, 0.0)
    h = jnp.dot(bf(h), bf(w3), preferred_element_type=jnp.float32) \
        + bf(b3).astype(jnp.float32)
    return jnp.tanh(h)


if __name__ == "__main__":
    # Small shapes consistent with the module's forward(z): z is (batch, latent_dim)
    batch = 64
    input_dim = 16
    latent_dim = 8
    hidden_dim = 32

    key = jax.random.PRNGKey(0)
    kz, kp = jax.random.split(key)
    z = jax.random.normal(kz, (batch, latent_dim), jnp.float32)
    params = init_params(kp, input_dim, latent_dim, hidden_dim)

    out = jax.block_until_ready(gan_generator_forward(z, params))
    ref = reference_forward(z, params)

    assert out.shape == (batch, input_dim)
    # Tolerance covers bf16 re-rounding of intermediate activations at the
    # matmul inputs (parameters are identically quantized in the reference).
    assert jnp.allclose(out, ref, atol=5e-3, rtol=5e-3), (
        "mismatch vs reference: max abs diff "
        f"{float(jnp.max(jnp.abs(out - ref)))}")
    print("KERNEL_OK")
</pallas_src>

<mosaic_0001>
module attributes {stable_mosaic.version = 11 : i64} {
  func.func @generator_kernel(%arg0: memref<64x16xf32, #tpu.memory_space<vmem>>, %arg1: memref<288x128xbf16, #tpu.memory_space<vmem>>, %arg2: memref<64x128xf32, #tpu.memory_space<vmem>>) attributes {dimension_semantics = [], scalar_prefetch = 0 : i64, scratch_operands = 0 : i64, tpu.core_type = #tpu.core_type<tc>} {
    %c272 = arith.constant 272 : index
    %c0 = arith.constant 0 : index
    %0 = vector.load %arg1[%c272, %c0] : memref<288x128xbf16, #tpu.memory_space<vmem>>, vector<16x128xbf16>
    %1 = arith.extf %0 : vector<16x128xbf16> to vector<16x128xf32>
    %2 = vector.extract_strided_slice %1 {offsets = [0, 0], sizes = [1, 128], strides = [1, 1]} : vector<16x128xf32> to vector<1x128xf32>
    %3 = vector.extract_strided_slice %1 {offsets = [1, 0], sizes = [1, 128], strides = [1, 1]} : vector<16x128xf32> to vector<1x128xf32>
    %4 = vector.extract_strided_slice %1 {offsets = [2, 0], sizes = [1, 128], strides = [1, 1]} : vector<16x128xf32> to vector<1x128xf32>
    %5 = vector.extract_strided_slice %1 {offsets = [3, 0], sizes = [1, 128], strides = [1, 1]} : vector<16x128xf32> to vector<1x128xf32>
    %6 = vector.extract_strided_slice %1 {offsets = [4, 0], sizes = [1, 128], strides = [1, 1]} : vector<16x128xf32> to vector<1x128xf32>
    %c0_0 = arith.constant 0 : index
    %c0_1 = arith.constant 0 : index
    %7 = vector.load %arg0[%c0_0, %c0_1] : memref<64x16xf32, #tpu.memory_space<vmem>>, vector<64x16xf32>
    %8 = arith.truncf %7 : vector<64x16xf32> to vector<64x16xbf16>
    %c0_2 = arith.constant 0 : index
    %c0_3 = arith.constant 0 : index
    %9 = vector.load %arg1[%c0_2, %c0_3] : memref<288x128xbf16, #tpu.memory_space<vmem>>, vector<16x128xbf16>
    %cst = arith.constant dense<0.000000e+00> : vector<64x128xf32>
    %10 = tpu.matmul %8, %9, %cst {dimension_numbers = #tpu.dot_dimension_numbers<[1], [0], [0], [1], [0, 0, 1, 1], [], []>} : vector<64x16xbf16>, vector<16x128xbf16>, vector<64x128xf32> -> vector<64x128xf32>
    %cst_4 = arith.constant dense<0.000000e+00> : vector<128xf32>
    %11 = vector.multi_reduction <add>, %10, %cst_4 [0] : vector<64x128xf32> to vector<128xf32>
    %12 = vector.shape_cast %11 : vector<128xf32> to vector<1x128xf32>
    %cst_5 = arith.constant 6.400000e+01 : f32
    %13 = vector.broadcast %cst_5 : f32 to vector<1x128xf32>
    %14 = arith.divf %12, %13 : vector<1x128xf32>
    %15 = vector.broadcast %14 : vector<1x128xf32> to vector<64x128xf32>
    %16 = arith.subf %10, %15 : vector<64x128xf32>
    %17 = arith.mulf %16, %16 : vector<64x128xf32>
    %cst_6 = arith.constant dense<0.000000e+00> : vector<128xf32>
    %18 = vector.multi_reduction <add>, %17, %cst_6 [0] : vector<64x128xf32> to vector<128xf32>
    %19 = vector.shape_cast %18 : vector<128xf32> to vector<1x128xf32>
    %cst_7 = arith.constant 6.400000e+01 : f32
    %20 = vector.broadcast %cst_7 : f32 to vector<1x128xf32>
    %21 = arith.divf %19, %20 : vector<1x128xf32>
    %cst_8 = arith.constant 9.99999974E-6 : f32
    %22 = vector.broadcast %cst_8 : f32 to vector<1x128xf32>
    %23 = arith.addf %21, %22 : vector<1x128xf32>
    %24 = math.rsqrt %23 : vector<1x128xf32>
    %25 = arith.mulf %2, %24 : vector<1x128xf32>
    %26 = vector.broadcast %25 : vector<1x128xf32> to vector<64x128xf32>
    %27 = arith.mulf %16, %26 : vector<64x128xf32>
    %28 = vector.broadcast %3 : vector<1x128xf32> to vector<64x128xf32>
    %29 = arith.addf %27, %28 : vector<64x128xf32>
    %cst_9 = arith.constant 2.000000e-01 : f32
    %30 = vector.broadcast %cst_9 : f32 to vector<64x128xf32>
    %31 = arith.mulf %30, %29 : vector<64x128xf32>
    %32 = arith.maximumf %29, %31 : vector<64x128xf32>
    %33 = arith.truncf %32 : vector<64x128xf32> to vector<64x128xbf16>
    %c16 = arith.constant 16 : index
    %c0_10 = arith.constant 0 : index
    %34 = vector.load %arg1[%c16, %c0_10] : memref<288x128xbf16, #tpu.memory_space<vmem>>, vector<128x128xbf16>
    %cst_11 = arith.constant dense<0.000000e+00> : vector<64x128xf32>
    %35 = tpu.matmul %33, %34, %cst_11 {dimension_numbers = #tpu.dot_dimension_numbers<[1], [0], [0], [1], [0, 0, 1, 1], [], []>} : vector<64x128xbf16>, vector<128x128xbf16>, vector<64x128xf32> -> vector<64x128xf32>
    %cst_12 = arith.constant dense<0.000000e+00> : vector<128xf32>
    %36 = vector.multi_reduction <add>, %35, %cst_12 [0] : vector<64x128xf32> to vector<128xf32>
    %37 = vector.shape_cast %36 : vector<128xf32> to vector<1x128xf32>
    %cst_13 = arith.constant 6.400000e+01 : f32
    %38 = vector.broadcast %cst_13 : f32 to vector<1x128xf32>
    %39 = arith.divf %37, %38 : vector<1x128xf32>
    %40 = vector.broadcast %39 : vector<1x128xf32> to vector<64x128xf32>
    %41 = arith.subf %35, %40 : vector<64x128xf32>
    %42 = arith.mulf %41, %41 : vector<64x128xf32>
    %cst_14 = arith.constant dense<0.000000e+00> : vector<128xf32>
    %43 = vector.multi_reduction <add>, %42, %cst_14 [0] : vector<64x128xf32> to vector<128xf32>
    %44 = vector.shape_cast %43 : vector<128xf32> to vector<1x128xf32>
    %cst_15 = arith.constant 6.400000e+01 : f32
    %45 = vector.broadcast %cst_15 : f32 to vector<1x128xf32>
    %46 = arith.divf %44, %45 : vector<1x128xf32>
    %cst_16 = arith.constant 9.99999974E-6 : f32
    %47 = vector.broadcast %cst_16 : f32 to vector<1x128xf32>
    %48 = arith.addf %46, %47 : vector<1x128xf32>
    %49 = math.rsqrt %48 : vector<1x128xf32>
    %50 = arith.mulf %4, %49 : vector<1x128xf32>
    %51 = vector.broadcast %50 : vector<1x128xf32> to vector<64x128xf32>
    %52 = arith.mulf %41, %51 : vector<64x128xf32>
    %53 = vector.broadcast %5 : vector<1x128xf32> to vector<64x128xf32>
    %54 = arith.addf %52, %53 : vector<64x128xf32>
    %cst_17 = arith.constant 0.000000e+00 : f32
    %55 = vector.broadcast %cst_17 : f32 to vector<64x128xf32>
    %56 = arith.maximumf %54, %55 : vector<64x128xf32>
    %57 = arith.truncf %56 : vector<64x128xf32> to vector<64x128xbf16>
    %c144 = arith.constant 144 : index
    %c0_18 = arith.constant 0 : index
    %58 = vector.load %arg1[%c144, %c0_18] : memref<288x128xbf16, #tpu.memory_space<vmem>>, vector<128x128xbf16>
    %cst_19 = arith.constant dense<0.000000e+00> : vector<64x128xf32>
    %59 = tpu.matmul %57, %58, %cst_19 {dimension_numbers = #tpu.dot_dimension_numbers<[1], [0], [0], [1], [0, 0, 1, 1], [], []>} : vector<64x128xbf16>, vector<128x128xbf16>, vector<64x128xf32> -> vector<64x128xf32>
    %60 = vector.broadcast %6 : vector<1x128xf32> to vector<64x128xf32>
    %61 = arith.addf %59, %60 : vector<64x128xf32>
    %62 = math.tanh %61 : vector<64x128xf32>
    %c0_20 = arith.constant 0 : index
    %c0_21 = arith.constant 0 : index
    %63 = vector.load %arg2[%c0_20, %c0_21] : memref<64x128xf32, #tpu.memory_space<vmem>>, vector<64x128xf32>
    tpu.vector_store %arg2[%c0_20, %c0_21], %62 {strides = array<i32>} : memref<64x128xf32, #tpu.memory_space<vmem>>, vector<64x128xf32>,
    return
  }
}

</mosaic_0001>

<bundles_post_ra>
// kernel: tpu_custom_call.1
= control target key start
LH: loop header
LB: loop body
LE: loop exit
PB: predicated region body
PF: predicated region fallthrough
CT: control target
= control target key end

     0   :  { %7 = vsyncpa [#allocation3], 0  ;;  %s883_s0 = inlined_call_operand.vmem [shape: f32[64,16], index: 0, kind: input, shape index: {}]   ;;  %s884_s1 = inlined_call_operand.hbm [shape: bf16[288,128], index: 1, kind: input, shape index: {}]   ;;  %s885_s2 = inlined_call_operand.hbm [shape: f32[64,128], index: 2, kind: output, shape index: {}]  }
   0x1   :  { %8 = vsyncpa [#allocation4], 0  ;;  %s796_s9 = smov [#allocation2]   ;;  %s748_s13 = scalar_lea.hbm %s884_s1, 2304 }
   0x2   :  { %s16_s10 = sshll.u32 %s796_s9, 4  ;;  %p749_p0 = scmp.ne.s32.totalorder %s884_s1, %s748_s13  ;;  %s17_s10 = int_to_ptr.vmem [resolvable:$true] %s16_s10 }
   0x3   :  { %p752_p1 = scmp.lt.u32.totalorder %s748_s13, %s884_s1 }
   0x5   :  { %p754_p2 = pnand %p752_p1, %p749_p0 }
   0x7   :  { %757 = shalt.err (!%p754_p2)
}
   0x8   :  { %s758_s18 = scalar_lea.vmem %s17_s10, 2304  ;;  %p763_p4 = scmp.lt.s32.totalorder %s17_s10, %s17_s10 }
   0x9   :  { %p759_p3 = scmp.ne.s32.totalorder %s17_s10, %s758_s18  ;;  %p764_p5 = scmp.lt.s32.totalorder %s758_s18, %s758_s18 }
   0xb   :  { %p765_p6 = por %p764_p5, %p763_p4 }
   0xd   :  { %p766_p7 = pnand %p765_p6, %p759_p3 }
   0xf   :  { %769 = shalt.err (!%p766_p7)
}
  0x10   :  { %s797_s19 = smov 64   ;;  %s798_s20 = smov 4  }
  0x11   :  { %22 = dma.hbm_to_vmem [thread:$0]  %s884_s1, 2304, %s17_s10, [#allocation3], %s797_s19, %s797_s19, %s798_s20  }
  0x12   :  { %792 = dma.done.wait [#allocation3], 2304  }
  0x13   :  { %793 = vsyncadd [#allocation3], 4294964992  ;;  %v711_v0 = vld [vmem:[#allocation2] sm:$0xff]   ;;  %v30_v2 = vld [vmem:[%s883_s0 + $0x8] sm:$0xff]  ;;  %vm49_vm0 = vcmask 130048  }
  0x14   :  { %v29_v1 = vld [vmem:[%s883_s0] sm:$0xff]  ;;  %v31_v3 = vld [vmem:[%s883_s0 + $0x10] sm:$0xff]  ;;  %647 = vmatprep.subr.bf16.mxu0 %v711_v0  ;;  %v32_v5 = vld [vmem:[%s883_s0 + $0x18] sm:$0xff] }
  0x15   :  { %v37_v4 = vpack.c.bf16 %v30_v2, %v29_v1  ;;  %v33_v6 = vld [vmem:[%s883_s0 + $0x20] sm:$0xff]  ;;  %v34_v7 = vld [vmem:[%s883_s0 + $0x28] sm:$0xff]  ;;  %648 = vmatpush3.bf16.msra.mxu0 %v711_v0  ;;  %v38_v8 = vpack.c.bf16 %v32_v5, %v31_v3  ;;  %v35_v10 = vld [vmem:[%s883_s0 + $0x30] sm:$0xff] }
  0x16   :  { %v39_v9 = vpack.c.bf16 %v34_v7, %v33_v6  ;;  %v36_v11 = vld [vmem:[%s883_s0 + $0x38] sm:$0xff]  ;;  %v712_v13 = vld [vmem:[#allocation2 + $0x8] sm:$0xff]   ;;  %v713_v14 = vld [vmem:[#allocation2 + $0x10] sm:$0xff]   ;;  %s799_s0 = smov [#allocation5]  }
  0x17   :  { %649 = vmatprep.mubr.msk.bf16.mxu0 %vm49_vm0, %v37_v4  ;;  %v40_v12 = vpack.c.bf16 %v36_v11, %v35_v10  ;;  %657 = vmatprep.subr.bf16.mxu1 %v712_v13  ;;  %v714_v15 = vld [vmem:[#allocation2 + $0x18] sm:$0xff]   ;;  %v715_v16 = vld [vmem:[#allocation2 + $0x20] sm:$0xff]   ;;  %v716_v17 = vld [vmem:[#allocation2 + $0x28] sm:$0xff]   ;;  %v175_v10 = vlaneseq  ;;  %s585_s10 = sshll.u32 %s799_s0, 4  ;;  %s586_s10 = int_to_ptr.vmem [resolvable:$true] %s585_s10 }
  0x18   :  { %650 = vmatmul.mubr.msk.bf16.vlgmr.msra.gmra.mrb[0].mxu0 %vm49_vm0, %v38_v8  ;;  %658 = vmatpush3.bf16.msra.mxu1 %v712_v13  ;;  %v717_v18 = vld [vmem:[#allocation2 + $0x30] sm:$0xff]   ;;  %v718_v19 = vld [vmem:[#allocation2 + $0x38] sm:$0xff]   ;;  %v719_v20 = vld [vmem:[#allocation2 + $0x40] sm:$0xff]   ;;  %s770_s11 = scalar_lea.vmem %s586_s10, 1024  ;;  %p775_p9 = scmp.lt.s32.totalorder %s586_s10, %s586_s10 }
  0x19   :  { %653 = vmatprep.mubr.msk.bf16.mxu0 %vm49_vm0, %v39_v9  ;;  %659 = vmatprep.subr.bf16.mxu1 %v713_v14  ;;  %v27_v11 = vld [vmem:[#allocation2 + $0x88] sm:$0xf]  ;;  %p771_p8 = scmp.ne.s32.totalorder %s586_s10, %s770_s11  ;;  %p776_p10 = scmp.lt.s32.totalorder %s770_s11, %s770_s11 }
  0x1a   :  { %v859_v13 = vunpack.c.l.bf16 %v27_v11 }
  0x1b   :  { %p777_p11 = por %p776_p10, %p775_p9 }
  0x1c   :  { %660 = vmatpush3.bf16.msra.mxu1 %v713_v14 }
  0x1d   :  { %661 = vmatprep.subr.bf16.mxu1 %v714_v15  ;;  %p778_p12 = pnand %p777_p11, %p771_p8 }
  0x20   :  { %654 = vmatmul.mubr.msk.bf16.gmra.mrb[4].mxu0 %vm49_vm0, %v40_v12  ;;  %662 = vmatpush3.bf16.msra.mxu1 %v714_v15  ;;  %v857_v12 = vshrl.u32 %v175_v10, 7 }
  0x21   :  { %663 = vmatprep.subr.bf16.mxu1 %v715_v16 }
  0x22   :  { %v177_v14 = vsub.s32 0, %v857_v12  ;;  %v189_v15 = vsub.s32 1, %v857_v12 }
  0x24   :  { %664 = vmatpush3.bf16.msra.mxu1 %v715_v16 }
  0x25   :  { %665 = vmatprep.subr.bf16.mxu1 %v716_v17 }
  0x28   :  { %666 = vmatpush3.bf16.msra.mxu1 %v716_v17 }
  0x29   :  { %667 = vmatprep.subr.bf16.mxu1 %v717_v18 }
  0x2c   :  { %668 = vmatpush3.bf16.msra.mxu1 %v717_v18 }
  0x2d   :  { %669 = vmatprep.subr.bf16.mxu1 %v718_v19 }
  0x30   :  { %670 = vmatpush3.bf16.msra.mxu1 %v718_v19  ;;  %v190_v19 = vrot.slane %v859_v13, %v189_v15 }
  0x31   :  { %671 = vmatprep.subr.bf16.mxu1 %v719_v20 }
  0x34   :  { %672 = vmatpush3.bf16.msra.mxu1 %v719_v20 }
  0xeb   :  { %v651_v21 = vpop.f32.mrb[0].mxu0 }
  0xec   :  { %v96_v22 = vpop.f32.mrb[1].mxu0 }
  0xed   :  { %v652_v23 = vpop.f32.mrb[2].mxu0 }
  0xee   :  { %v99_v24 = vpop.f32.mrb[3].mxu0 }
  0xef   :  { %v127_v25 = vadd.f32 %v99_v24, %v96_v22 }
  0xf1   :  { %v128_v26 = vadd.f32 %v651_v21, %v127_v25 }
  0xf3   :  { %v655_v27 = vpop.f32.mrb[4].mxu0  ;;  %v129_v28 = vadd.f32 %v652_v23, %v128_v26 }
  0xf4   :  { %v112_v29 = vpop.f32.mrb[5].mxu0 }
  0xf5   :  { %v130_v30 = vadd.f32 %v129_v28, %v112_v29  ;;  %v656_v31 = vpop.f32.mrb[6].mxu0 }
  0xf6   :  { %v115_v32 = vpop.f32.mrb[7].mxu0 }
  0xf7   :  { %v131_v33 = vadd.f32 %v130_v30, %v115_v32 }
  0xf9   :  { %v132_v34 = vadd.f32 %v655_v27, %v131_v33 }
  0xfb   :  { %v133_v35 = vadd.f32 %v656_v31, %v132_v34 }
  0xfd   :  { %v134_v36 = vrot.slane %v133_v35, 4 }
  0xff   :  { %v135_v37 = vadd.f32 %v134_v36, %v133_v35 }
 0x101   :  { %v136_v38 = vrot.slane %v135_v37, 2 }
 0x103   :  { %v137_v39 = vadd.f32 %v136_v38, %v135_v37 }
 0x105   :  { %v138_v40 = vrot.slane %v137_v39, 1 }
 0x107   :  { %v139_v41 = vadd.f32 %v138_v40, %v137_v39 }
 0x109   :  { %v141_v42 = vmul.f32 0.015625, %v139_v41 }
 0x10b   :  { %v142_v43 = vsub.f32 %v96_v22, %v141_v42  ;;  %v143_v44 = vsub.f32 %v99_v24, %v141_v42  ;;  %v144_v45 = vsub.f32 %v651_v21, %v141_v42  ;;  %v145_v46 = vsub.f32 %v652_v23, %v141_v42 }
 0x10c   :  { %v146_v47 = vsub.f32 %v112_v29, %v141_v42  ;;  %v147_v48 = vsub.f32 %v115_v32, %v141_v42  ;;  %v148_v49 = vsub.f32 %v655_v27, %v141_v42  ;;  %v149_v50 = vsub.f32 %v656_v31, %v141_v42 }
 0x10d   :  { %v150_v51 = vmul.f32 %v142_v43, %v142_v43  ;;  %v151_v52 = vmul.f32 %v143_v44, %v143_v44  ;;  %v152_v53 = vmul.f32 %v144_v45, %v144_v45  ;;  %v153_v55 = vmul.f32 %v145_v46, %v145_v46 }
 0x10e   :  { %v154_v57 = vmul.f32 %v146_v47, %v146_v47  ;;  %v155_v59 = vmul.f32 %v147_v48, %v147_v48  ;;  %v156_v61 = vmul.f32 %v148_v49, %v148_v49  ;;  %v157_v63 = vmul.f32 %v149_v50, %v149_v50 }
 0x10f   :  { %v158_v54 = vadd.f32 %v151_v52, %v150_v51 }
 0x111   :  { %v159_v56 = vadd.f32 %v158_v54, %v152_v53 }
 0x113   :  { %v160_v58 = vadd.f32 %v159_v56, %v153_v55  ;;  %v720_v56 = vld [vmem:[#allocation2 + $0x48] sm:$0xff]  }
 0x114   :  { %681 = vmatprep.subr.bf16.mxu0 %v720_v56 }
 0x115   :  { %v161_v60 = vadd.f32 %v160_v58, %v154_v57  ;;  %682 = vmatpush3.bf16.msra.mxu0 %v720_v56  ;;  %v721_v57 = vld [vmem:[#allocation2 + $0x50] sm:$0xff]   ;;  %v722_v58 = vld [vmem:[#allocation2 + $0x58] sm:$0xff]   ;;  %v409_v56 = vsub.s32 3, %v857_v12 }
 0x116   :  { %683 = vmatprep.subr.bf16.mxu0 %v721_v57 }
 0x117   :  { %v162_v62 = vadd.f32 %v161_v60, %v155_v59  ;;  %v723_v59 = vld [vmem:[#allocation2 + $0x60] sm:$0xff]   ;;  %v724_v60 = vld [vmem:[#allocation2 + $0x68] sm:$0xff]  }
 0x119   :  { %v163_v0 = vadd.f32 %v162_v62, %v156_v61  ;;  %684 = vmatpush3.bf16.msra.mxu0 %v721_v57  ;;  %v725_v61 = vld [vmem:[#allocation2 + $0x70] sm:$0xff]   ;;  %v726_v62 = vld [vmem:[#allocation2 + $0x78] sm:$0xff]  }
 0x11a   :  { %685 = vmatprep.subr.bf16.mxu0 %v722_v58 }
 0x11b   :  { %v164_v1 = vadd.f32 %v163_v0, %v157_v63  ;;  %v727_v63 = vld [vmem:[#allocation2 + $0x80] sm:$0xff]  }
 0x11d   :  { %v165_v2 = vrot.slane %v164_v1, 4  ;;  %686 = vmatpush3.bf16.msra.mxu0 %v722_v58 }
 0x11e   :  { %687 = vmatprep.subr.bf16.mxu0 %v723_v59 }
 0x11f   :  { %v166_v3 = vadd.f32 %v165_v2, %v164_v1 }
 0x121   :  { %v167_v4 = vrot.slane %v166_v3, 2  ;;  %688 = vmatpush3.bf16.msra.mxu0 %v723_v59 }
 0x122   :  { %689 = vmatprep.subr.bf16.mxu0 %v724_v60 }
 0x123   :  { %v168_v5 = vadd.f32 %v167_v4, %v166_v3 }
 0x125   :  { %v169_v6 = vrot.slane %v168_v5, 1  ;;  %690 = vmatpush3.bf16.msra.mxu0 %v724_v60  ;;  %v410_v60 = vrot.slane %v859_v13, %v409_v56 }
 0x126   :  { %691 = vmatprep.subr.bf16.mxu0 %v725_v61 }
 0x127   :  { %v170_v7 = vadd.f32 %v169_v6, %v168_v5 }
 0x129   :  { %v171_v8 = vmul.f32 0.015625, %v170_v7  ;;  %692 = vmatpush3.bf16.msra.mxu0 %v725_v61 }
 0x12a   :  { %693 = vmatprep.subr.bf16.mxu0 %v726_v62 }
 0x12b   :  { %v172_v9 = vadd.f32 1e-05, %v171_v8 }
 0x12d   :  { %728 = vrsqrt.f32 %v172_v9  ;;  %694 = vmatpush3.bf16.msra.mxu0 %v726_v62 }
 0x12e   :  { %695 = vmatprep.subr.bf16.mxu0 %v727_v63 }
 0x131   :  { %696 = vmatpush3.bf16.msra.mxu0 %v727_v63 }
 0x137   :  { %v729_v16 = vpop.eup %728 }
 0x138   :  { %v174_v17 = vmul.f32 %v729_v16, %v859_v13 }
 0x13a   :  { %v178_v18 = vrot.slane %v174_v17, %v177_v14 }
 0x13c   :  { %v184_v20 = vmul.f32 %v178_v18, %v147_v48  ;;  %v179_v21 = vmul.f32 %v178_v18, %v142_v43  ;;  %v180_v22 = vmul.f32 %v178_v18, %v143_v44  ;;  %v181_v23 = vmul.f32 %v178_v18, %v144_v45 }
 0x13d   :  { %v182_v24 = vmul.f32 %v178_v18, %v145_v46  ;;  %v183_v25 = vmul.f32 %v178_v18, %v146_v47  ;;  %v185_v26 = vmul.f32 %v178_v18, %v148_v49  ;;  %v186_v27 = vmul.f32 %v178_v18, %v149_v50 }
 0x13e   :  { %v196_v28 = vadd.f32 %v190_v19, %v184_v20  ;;  %v191_v29 = vadd.f32 %v190_v19, %v179_v21  ;;  %v192_v30 = vadd.f32 %v190_v19, %v180_v22  ;;  %v193_v31 = vadd.f32 %v190_v19, %v181_v23 }
 0x13f   :  { %v194_v32 = vadd.f32 %v190_v19, %v182_v24  ;;  %v195_v33 = vadd.f32 %v190_v19, %v183_v25  ;;  %v197_v34 = vadd.f32 %v190_v19, %v185_v26  ;;  %v198_v35 = vadd.f32 %v190_v19, %v186_v27 }
 0x140   :  { %v204_v36 = vmul.f32 0.2, %v196_v28  ;;  %v199_v37 = vmul.f32 0.2, %v191_v29  ;;  %v200_v38 = vmul.f32 0.2, %v192_v30 }
 0x141   :  { %v201_v39 = vmul.f32 0.2, %v193_v31  ;;  %v202_v40 = vmul.f32 0.2, %v194_v32  ;;  %v203_v41 = vmul.f32 0.2, %v195_v33 }
 0x142   :  { %v207_v42 = vmax.f32 %v191_v29, %v199_v37  ;;  %v208_v43 = vmax.f32 %v192_v30, %v200_v38  ;;  %v212_v44 = vmax.f32 %v196_v28, %v204_v36  ;;  %v205_v45 = vmul.f32 0.2, %v197_v34 }
 0x143   :  { %v209_v46 = vmax.f32 %v193_v31, %v201_v39  ;;  %v210_v47 = vmax.f32 %v194_v32, %v202_v40  ;;  %v211_v48 = vmax.f32 %v195_v33, %v203_v41  ;;  %v206_v49 = vmul.f32 0.2, %v198_v35 }
 0x144   :  { %v215_v50 = vpack.c.bf16 %v208_v43, %v207_v42  ;;  %v213_v51 = vmax.f32 %v197_v34, %v205_v45 }
 0x145   :  { %v216_v52 = vpack.c.bf16 %v210_v47, %v209_v46  ;;  %v217_v53 = vpack.c.bf16 %v212_v44, %v211_v48  ;;  %v214_v54 = vmax.f32 %v198_v35, %v206_v49 }
 0x146   :  { %673 = vmatprep.mubr.bf16.mxu1 %v215_v50 }
 0x147   :  { %674 = vmatmul.mubr.bf16.vlgmr.msra.gmra.mrb[0].mxu1 %v216_v52  ;;  %v218_v55 = vpack.c.bf16 %v214_v54, %v213_v51 }
 0x148   :  { %677 = vmatprep.mubr.bf16.mxu1 %v217_v53 }
 0x14f   :  { %678 = vmatmul.mubr.bf16.gmra.mrb[4].mxu1 %v218_v55  ;;  %v397_v55 = vsub.s32 2, %v857_v12 }
 0x21a   :  { %v675_v0 = vpop.f32.mrb[0].mxu1 }
 0x21b   :  { %v317_v1 = vpop.f32.mrb[1].mxu1 }
 0x21c   :  { %v676_v2 = vpop.f32.mrb[2].mxu1 }
 0x21d   :  { %v320_v3 = vpop.f32.mrb[3].mxu1 }
 0x21e   :  { %v348_v4 = vadd.f32 %v320_v3, %v317_v1 }
 0x220   :  { %v349_v5 = vadd.f32 %v675_v0, %v348_v4 }
 0x222   :  { %v679_v6 = vpop.f32.mrb[4].mxu1  ;;  %v350_v7 = vadd.f32 %v676_v2, %v349_v5 }
 0x223   :  { %v333_v8 = vpop.f32.mrb[5].mxu1 }
 0x224   :  { %v351_v9 = vadd.f32 %v350_v7, %v333_v8  ;;  %v680_v10 = vpop.f32.mrb[6].mxu1 }
 0x225   :  { %v336_v11 = vpop.f32.mrb[7].mxu1 }
 0x226   :  { %v352_v14 = vadd.f32 %v351_v9, %v336_v11 }
 0x228   :  { %v353_v15 = vadd.f32 %v679_v6, %v352_v14 }
 0x22a   :  { %v354_v16 = vadd.f32 %v680_v10, %v353_v15 }
 0x22c   :  { %v355_v17 = vrot.slane %v354_v16, 4 }
 0x22e   :  { %v356_v18 = vadd.f32 %v355_v17, %v354_v16 }
 0x230   :  { %v357_v19 = vrot.slane %v356_v18, 2 }
 0x232   :  { %v358_v20 = vadd.f32 %v357_v19, %v356_v18 }
 0x234   :  { %v359_v21 = vrot.slane %v358_v20, 1 }
 0x236   :  { %v360_v22 = vadd.f32 %v359_v21, %v358_v20 }
 0x238   :  { %v361_v23 = vmul.f32 0.015625, %v360_v22 }
 0x23a   :  { %v362_v24 = vsub.f32 %v317_v1, %v361_v23  ;;  %v363_v25 = vsub.f32 %v320_v3, %v361_v23  ;;  %v364_v26 = vsub.f32 %v675_v0, %v361_v23  ;;  %v365_v27 = vsub.f32 %v676_v2, %v361_v23 }
 0x23b   :  { %v366_v28 = vsub.f32 %v333_v8, %v361_v23  ;;  %v367_v29 = vsub.f32 %v336_v11, %v361_v23  ;;  %v368_v30 = vsub.f32 %v679_v6, %v361_v23  ;;  %v369_v31 = vsub.f32 %v680_v10, %v361_v23 }
 0x23c   :  { %v370_v32 = vmul.f32 %v362_v24, %v362_v24  ;;  %v371_v33 = vmul.f32 %v363_v25, %v363_v25  ;;  %v372_v34 = vmul.f32 %v364_v26, %v364_v26  ;;  %v373_v36 = vmul.f32 %v365_v27, %v365_v27 }
 0x23d   :  { %v374_v38 = vmul.f32 %v366_v28, %v366_v28  ;;  %v375_v40 = vmul.f32 %v367_v29, %v367_v29  ;;  %v376_v42 = vmul.f32 %v368_v30, %v368_v30  ;;  %v377_v44 = vmul.f32 %v369_v31, %v369_v31 }
 0x23e   :  { %v378_v35 = vadd.f32 %v371_v33, %v370_v32 }
 0x240   :  { %v379_v37 = vadd.f32 %v378_v35, %v372_v34 }
 0x242   :  { %v380_v39 = vadd.f32 %v379_v37, %v373_v36 }
 0x244   :  { %v381_v41 = vadd.f32 %v380_v39, %v374_v38 }
 0x246   :  { %v382_v43 = vadd.f32 %v381_v41, %v375_v40 }
 0x248   :  { %v383_v45 = vadd.f32 %v382_v43, %v376_v42 }
 0x24a   :  { %v384_v46 = vadd.f32 %v383_v45, %v377_v44 }
 0x24c   :  { %v385_v47 = vrot.slane %v384_v46, 4 }
 0x24e   :  { %v386_v48 = vadd.f32 %v385_v47, %v384_v46 }
 0x250   :  { %v387_v49 = vrot.slane %v386_v48, 2 }
 0x252   :  { %v388_v50 = vadd.f32 %v387_v49, %v386_v48 }
 0x254   :  { %v389_v51 = vrot.slane %v388_v50, 1 }
 0x256   :  { %v390_v52 = vadd.f32 %v389_v51, %v388_v50 }
 0x258   :  { %v391_v53 = vmul.f32 0.015625, %v390_v52 }
 0x25a   :  { %v392_v54 = vadd.f32 1e-05, %v391_v53 }
 0x25c   :  { %730 = vrsqrt.f32 %v392_v54 }
 0x266   :  { %v731_v57 = vpop.eup %730 }
 0x267   :  { %v394_v58 = vmul.f32 %v731_v57, %v859_v13 }
 0x269   :  { %v398_v59 = vrot.slane %v394_v58, %v397_v55 }
 0x26b   :  { %v402_v61 = vmul.f32 %v398_v59, %v365_v27  ;;  %v404_v62 = vmul.f32 %v398_v59, %v367_v29  ;;  %v399_v63 = vmul.f32 %v398_v59, %v362_v24  ;;  %v400_v0 = vmul.f32 %v398_v59, %v363_v25 }
 0x26c   :  { %v401_v1 = vmul.f32 %v398_v59, %v364_v26  ;;  %v403_v2 = vmul.f32 %v398_v59, %v366_v28  ;;  %v405_v3 = vmul.f32 %v398_v59, %v368_v30  ;;  %v406_v4 = vmul.f32 %v398_v59, %v369_v31 }
 0x26d   :  { %v416_v5 = vadd.f32 %v410_v60, %v404_v62  ;;  %v411_v6 = vadd.f32 %v410_v60, %v399_v63  ;;  %v412_v7 = vadd.f32 %v410_v60, %v400_v0  ;;  %v414_v8 = vadd.f32 %v410_v60, %v402_v61 }
 0x26e   :  { %v413_v9 = vadd.f32 %v410_v60, %v401_v1  ;;  %v415_v10 = vadd.f32 %v410_v60, %v403_v2  ;;  %v417_v11 = vadd.f32 %v410_v60, %v405_v3  ;;  %v418_v14 = vadd.f32 %v410_v60, %v406_v4 }
 0x26f   :  { %v424_v15 = vmax.f32 %v416_v5, 0.0  ;;  %v419_v16 = vmax.f32 %v411_v6, 0.0  ;;  %v420_v17 = vmax.f32 %v412_v7, 0.0  ;;  %v422_v18 = vmax.f32 %v414_v8, 0.0 }
 0x270   :  { %v421_v19 = vmax.f32 %v413_v9, 0.0  ;;  %v423_v20 = vmax.f32 %v415_v10, 0.0  ;;  %v425_v21 = vmax.f32 %v417_v11, 0.0  ;;  %v426_v22 = vmax.f32 %v418_v14, 0.0 }
 0x271   :  { %v427_v23 = vpack.c.bf16 %v420_v17, %v419_v16  ;;  %v449_v27 = vsub.s32 4, %v857_v12 }
 0x272   :  { %v428_v24 = vpack.c.bf16 %v422_v18, %v421_v19  ;;  %v429_v25 = vpack.c.bf16 %v424_v15, %v423_v20  ;;  %v430_v26 = vpack.c.bf16 %v426_v22, %v425_v21 }
 0x273   :  { %697 = vmatprep.mubr.bf16.mxu0 %v427_v23  ;;  %v450_v28 = vrot.slane %v859_v13, %v449_v27 }
 0x274   :  { %698 = vmatmul.mubr.bf16.vlgmr.msra.gmra.mrb[8].mxu0 %v428_v24 }
 0x275   :  { %701 = vmatprep.mubr.bf16.mxu0 %v429_v25 }
 0x27c   :  { %702 = vmatmul.mubr.bf16.gmra.mrb[12].mxu0 %v430_v26 }
 0x347   :  { %v699_v29 = vpop.f32.mrb[8].mxu0 }
 0x348   :  { %v542_v30 = vadd.f32 %v699_v29, %v450_v28  ;;  %v533_v31 = vpop.f32.mrb[9].mxu0 }
 0x349   :  { %v534_v32 = vadd.f32 %v533_v31, %v450_v28  ;;  %v700_v33 = vpop.f32.mrb[10].mxu0 }
 0x34a   :  { %732 = vtanh.f32 %v542_v30  ;;  %v545_v34 = vadd.f32 %v700_v33, %v450_v28  ;;  %v536_v35 = vpop.f32.mrb[11].mxu0 }
 0x34b   :  { %734 = vtanh.f32 %v534_v32  ;;  %v537_v36 = vadd.f32 %v536_v35, %v450_v28 }
 0x34c   :  { %736 = vtanh.f32 %v545_v34 }
 0x34d   :  { %738 = vtanh.f32 %v537_v36 }
 0x34f   :  { %v703_v37 = vpop.f32.mrb[12].mxu0 }
 0x350   :  { %v558_v38 = vadd.f32 %v703_v37, %v450_v28  ;;  %v549_v39 = vpop.f32.mrb[13].mxu0 }
 0x351   :  { %v550_v40 = vadd.f32 %v549_v39, %v450_v28  ;;  %v704_v41 = vpop.f32.mrb[14].mxu0 }
 0x352   :  { %740 = vtanh.f32 %v558_v38  ;;  %v561_v12 = vadd.f32 %v704_v41, %v450_v28  ;;  %v552_v13 = vpop.f32.mrb[15].mxu0 }
 0x353   :  { %742 = vtanh.f32 %v550_v40  ;;  %v553_v42 = vadd.f32 %v552_v13, %v450_v28 }
 0x354   :  { %v733_v43 = vpop.eup %732  ;;  %744 = vtanh.f32 %v561_v12 }
 0x355   :  { %v735_v44 = vpop.eup %734  ;;  %574 = vst [vmem:[#allocation5 + $0x10] sm:$0xff] %v733_v43  ;;  %746 = vtanh.f32 %v553_v42 }
 0x356   :  { %v737_v45 = vpop.eup %736  ;;  %572 = vst [vmem:[#allocation5] sm:$0xff] %v735_v44 }
 0x357   :  { %v739_v46 = vpop.eup %738  ;;  %575 = vst [vmem:[#allocation5 + $0x18] sm:$0xff] %v737_v45 }
 0x358   :  { %573 = vst [vmem:[#allocation5 + $0x8] sm:$0xff] %v739_v46 }
 0x35c   :  { %v741_v47 = vpop.eup %740 }
 0x35d   :  { %v743_v48 = vpop.eup %742  ;;  %578 = vst [vmem:[#allocation5 + $0x30] sm:$0xff] %v741_v47 }
 0x35e   :  { %v745_v49 = vpop.eup %744  ;;  %576 = vst [vmem:[#allocation5 + $0x20] sm:$0xff] %v743_v48 }
 0x35f   :  { %v747_v50 = vpop.eup %746  ;;  %579 = vst [vmem:[#allocation5 + $0x38] sm:$0xff] %v745_v49 }
 0x360   :  { %577 = vst [vmem:[#allocation5 + $0x28] sm:$0xff] %v747_v50 }
 0x361   :  { %781 = shalt.err (!%p778_p12)
}
 0x362   :  { %s782_s14 = scalar_lea.hbm %s885_s2, 1024 }
 0x363   :  { %p783_p13 = scmp.ne.s32.totalorder %s885_s2, %s782_s14  ;;  %p786_p0 = scmp.lt.u32.totalorder %s782_s14, %s885_s2 }
 0x365   :  { %p788_p1 = pnand %p786_p0, %p783_p13 }
 0x367   :  { %791 = shalt.err (!%p788_p1)
}
 0x368   :  { %s800_s19 = smov 128   ;;  %s801_s20 = smov 8  }
 0x369   :  { %591 = dma.vmem_to_hbm [thread:$0]  %s586_s10, 1024, %s885_s2, [#allocation4], %s800_s19, %s800_s19, %s801_s20  }
 0x36a   :  { %794 = dma.done.wait [#allocation4], 1024  }
 0x36b   :  { %795 = vsyncadd [#allocation4], 4294966272 }
 0x36c   :  { %595 = vsyncpa [#allocation3], 1 }
 0x36d   :  { %596 = vsyncpa [#allocation4], 1 }

</bundles_post_ra>
